<compile_context>
chip_gen: v7x
topology: tpu7x:2x2x1
jax: 0.10.0
libtpu: 0.0.40
codegen_flags: <defaults>
</compile_context>

<pallas_src>
import jax
import jax.numpy as jnp
from jax.experimental import pallas as pl
from jax.experimental.pallas import tpu as pltpu


def _round_up(x: int, m: int) -> int:
    return ((x + m - 1) // m) * m


# ----------------------------- Pallas kernel --------------------------------
def _prefix_mlp_kernel(x_ref, w1_ref, b1_ref, w2_ref, b2_ref, o_ref, h_ref):
    """Fused Linear(H->P) -> tanh -> Linear(P->tn) on one (row-tile, out-tile).

    Grid axes: i = row tile (parallel), j = output-column tile (arbitrary).
    The hidden activation h depends only on i, so it is computed at j == 0 and
    cached in VMEM scratch (bf16) for the remaining j steps.
    """
    j = pl.program_id(1)

    @pl.when(j == 0)
    def _():
        # (TM, H) @ (H, P) on the MXU, bf16 inputs, f32 accumulation.
        h = jnp.dot(x_ref[...], w1_ref[...], preferred_element_type=jnp.float32)
        h = jnp.tanh(h + b1_ref[...])                  # bias broadcast (1, P), f32
        h_ref[...] = h.astype(h_ref.dtype)             # cache as bf16

    # (TM, P) @ (P, TN) -> (TM, TN), f32 accumulation, f32 bias add.
    y = jnp.dot(h_ref[...], w2_ref[...], preferred_element_type=jnp.float32)
    o_ref[...] = (y + b2_ref[...]).astype(o_ref.dtype)


def prefix_mlp(x, w1, b1, w2, b2):
    """x: (N, H) -> (N, O) float32.  Tiled over (row tiles, output-col tiles)."""
    n, hdim = x.shape
    p = w1.shape[1]
    o = w2.shape[1]

    # Tile sizes: big row tiles to feed the MXU, lane-dense streamed output tiles.
    tm = min(_round_up(max(n, 1), 8), 256)
    tn = min(_round_up(o, 128), 512)

    n_pad = _round_up(n, tm)
    o_pad = _round_up(o, tn)

    # bf16 MXU operands, f32 biases/accumulation.
    xb = x.astype(jnp.bfloat16)
    if n_pad != n:
        xb = jnp.pad(xb, ((0, n_pad - n), (0, 0)))
    w1b = w1.astype(jnp.bfloat16)
    w2b = w2.astype(jnp.bfloat16)
    b1f = b1.astype(jnp.float32).reshape(1, p)
    b2f = b2.astype(jnp.float32).reshape(1, o)
    if o_pad != o:
        w2b = jnp.pad(w2b, ((0, 0), (0, o_pad - o)))
        b2f = jnp.pad(b2f, ((0, 0), (0, o_pad - o)))

    grid = (n_pad // tm, o_pad // tn)

    # Explicit VMEM budget (BlockSpec double-buffers each operand) + headroom.
    vmem_need = (
        2 * tm * hdim * 2        # x tile (bf16)
        + 2 * hdim * p * 2       # W1 (bf16, constant block)
        + 2 * 1 * p * 4          # b1 (f32)
        + 2 * p * tn * 2         # W2 tile (bf16)
        + 2 * 1 * tn * 4         # b2 tile (f32)
        + 2 * tm * tn * 4        # out tile (f32)
        + tm * p * 2             # h scratch (bf16)
    )
    vmem_limit = int(min(max(2 * vmem_need, 16 * 1024 * 1024), 64 * 1024 * 1024))

    out = pl.pallas_call(
        _prefix_mlp_kernel,
        out_shape=jax.ShapeDtypeStruct((n_pad, o_pad), jnp.float32),
        grid_spec=pltpu.PrefetchScalarGridSpec(
            num_scalar_prefetch=0,
            grid=grid,
            in_specs=[
                pl.BlockSpec((tm, hdim), lambda i, j: (i, 0)),   # x row tile
                pl.BlockSpec((hdim, p), lambda i, j: (0, 0)),    # W1 (resident)
                pl.BlockSpec((1, p), lambda i, j: (0, 0)),       # b1
                pl.BlockSpec((p, tn), lambda i, j: (0, j)),      # W2 streamed over O
                pl.BlockSpec((1, tn), lambda i, j: (0, j)),      # b2 streamed over O
            ],
            out_specs=pl.BlockSpec((tm, tn), lambda i, j: (i, j)),
            scratch_shapes=[pltpu.VMEM((tm, p), jnp.bfloat16)],  # cached hidden h
        ),
        compiler_params=pltpu.CompilerParams(
            dimension_semantics=("parallel", "arbitrary"),
            vmem_limit_bytes=vmem_limit,
        ),
    )(xb, w1b, b1f, w2b, b2f)

    return out[:n, :o]


# ------------------------------ Module wrapper -------------------------------
class PrefixEncoderParams:
    """Deterministically initialized parameters matching the torch module."""

    def __init__(self, key, *, pre_seq_len, hidden_size, prefix_hidden_size,
                 num_hidden_layers, prefix_projection):
        self.pre_seq_len = pre_seq_len
        self.prefix_projection = prefix_projection
        out_dim = num_hidden_layers * 2 * hidden_size
        k0, k1, k2, k3, k4 = jax.random.split(key, 5)
        if prefix_projection:
            # Embedding(pre_seq_len, hidden)
            self.embedding = jax.random.normal(
                k0, (pre_seq_len, hidden_size), jnp.float32)
            # Linear(hidden -> prefix_hidden)
            s1 = 1.0 / jnp.sqrt(hidden_size)
            self.w1 = jax.random.uniform(
                k1, (hidden_size, prefix_hidden_size), jnp.float32, -s1, s1)
            self.b1 = jax.random.uniform(
                k2, (1, prefix_hidden_size), jnp.float32, -s1, s1)
            # Linear(prefix_hidden -> 2*layers*hidden)
            s2 = 1.0 / jnp.sqrt(prefix_hidden_size)
            self.w2 = jax.random.uniform(
                k3, (prefix_hidden_size, out_dim), jnp.float32, -s2, s2)
            self.b2 = jax.random.uniform(
                k4, (1, out_dim), jnp.float32, -s2, s2)
        else:
            # Embedding(pre_seq_len, 2*layers*hidden)
            self.embedding = jax.random.normal(
                k0, (pre_seq_len, out_dim), jnp.float32)


def prefix_encoder_forward(params: PrefixEncoderParams, prefix: jnp.ndarray):
    """prefix: (B, L) int32 token ids in [0, pre_seq_len).
       returns: (B, L, 2*layers*hidden) float32."""
    b, l = prefix.shape
    if params.prefix_projection:
        # Embedding gather kept as JAX glue (could be fused in-kernel via
        # PrefetchScalarGridSpec + pl.Element row gather; negligible here since
        # pre_seq_len is tiny).  The MLP hot path runs in the Pallas kernel.
        tokens = jnp.take(params.embedding, prefix.reshape(-1), axis=0)  # (B*L, H)
        out = prefix_mlp(tokens, params.w1, params.b1, params.w2, params.b2)
        return out.reshape(b, l, -1)
    else:
        # TODO(synk): non-projection branch is a pure embedding gather (no matmul
        # hot path); left in JAX glue rather than a trivial copy kernel.
        return jnp.take(params.embedding, prefix.reshape(-1), axis=0).reshape(b, l, -1)


# Pure-JAX (f32) reference for correctness checking.
def prefix_encoder_ref(params: PrefixEncoderParams, prefix: jnp.ndarray):
    b, l = prefix.shape
    tokens = jnp.take(params.embedding, prefix.reshape(-1), axis=0)
    if params.prefix_projection:
        h = jnp.tanh(tokens @ params.w1 + params.b1)
        tokens = h @ params.w2 + params.b2
    return tokens.reshape(b, l, -1)


if __name__ == "__main__":
    # Small, module-consistent config:
    #   pre_seq_len=8, hidden=32, prefix_hidden=32, layers=2 -> out dim = 128
    B, L = 2, 8
    cfg = dict(pre_seq_len=8, hidden_size=32, prefix_hidden_size=32,
               num_hidden_layers=2, prefix_projection=True)
    out_dim = cfg["num_hidden_layers"] * 2 * cfg["hidden_size"]

    key = jax.random.PRNGKey(0)
    pkey, ikey = jax.random.split(key)
    params = PrefixEncoderParams(pkey, **cfg)

    # Input: (batch, prefix-length) integer token ids.
    prefix = jax.random.randint(ikey, (B, L), 0, cfg["pre_seq_len"], jnp.int32)

    out = prefix_encoder_forward(params, prefix)
    out = jax.block_until_ready(out)

    ref = prefix_encoder_ref(params, prefix)
    assert out.shape == (B, L, out_dim)
    # bf16 MXU operands vs f32 reference -> relaxed tolerance.
    assert jnp.allclose(out, ref, rtol=2e-2, atol=2e-2), "mismatch vs reference"

    # Sanity-check the non-projection branch (pure embedding gather, JAX glue).
    cfg_np = dict(cfg, prefix_projection=False)
    params_np = PrefixEncoderParams(pkey, **cfg_np)
    out_np = jax.block_until_ready(prefix_encoder_forward(params_np, prefix))
    ref_np = prefix_encoder_ref(params_np, prefix)
    assert out_np.shape == (B, L, out_dim)
    assert jnp.allclose(out_np, ref_np), "mismatch vs reference (no projection)"

    print("KERNEL_OK")
</pallas_src>

<mosaic_0001>
module attributes {stable_mosaic.version = 11 : i64} {
  func.func @_prefix_mlp_kernel(%arg0: i32, %arg1: i32, %arg2: memref<16x32xbf16, #tpu.memory_space<vmem>>, %arg3: memref<32x32xbf16, #tpu.memory_space<vmem>>, %arg4: memref<1x32xf32, #tpu.memory_space<vmem>>, %arg5: memref<32x128xbf16, #tpu.memory_space<vmem>>, %arg6: memref<1x128xf32, #tpu.memory_space<vmem>>, %arg7: memref<16x128xf32, #tpu.memory_space<vmem>>, %arg8: memref<16x32xbf16, #tpu.memory_space<vmem>>) attributes {dimension_semantics = [#tpu.dimension_semantics<parallel>, #tpu.dimension_semantics<arbitrary>], iteration_bounds = array<i64: 1, 1>, scalar_prefetch = 0 : i64, scratch_operands = 1 : i64, tpu.core_type = #tpu.core_type<tc>, window_params = [{transform_indices = @transform_0, window_bounds = array<i64: 16, 32>}, {pipeline_mode = #tpu.pipeline_mode<synchronous>, transform_indices = @transform_1, window_bounds = array<i64: 32, 32>}, {pipeline_mode = #tpu.pipeline_mode<synchronous>, transform_indices = @transform_2, window_bounds = array<i64: 1, 32>}, {transform_indices = @transform_3, window_bounds = array<i64: 32, 128>}, {transform_indices = @transform_4, window_bounds = array<i64: 1, 128>}, {transform_indices = @transform_5, window_bounds = array<i64: 16, 128>}]} {
    %c0_i32 = arith.constant 0 : i32
    %0 = arith.cmpi eq, %arg1, %c0_i32 : i32
    %1 = arith.extui %0 : i1 to i32
    %c0_i32_0 = arith.constant 0 : i32
    %2 = arith.cmpi ne, %1, %c0_i32_0 : i32
    scf.if %2 {
      %c0_8 = arith.constant 0 : index
      %c0_9 = arith.constant 0 : index
      %10 = vector.load %arg2[%c0_8, %c0_9] : memref<16x32xbf16, #tpu.memory_space<vmem>>, vector<16x32xbf16>
      %c0_10 = arith.constant 0 : index
      %c0_11 = arith.constant 0 : index
      %11 = vector.load %arg3[%c0_10, %c0_11] : memref<32x32xbf16, #tpu.memory_space<vmem>>, vector<32x32xbf16>
      %cst_12 = arith.constant dense<0.000000e+00> : vector<16x32xf32>
      %12 = tpu.matmul %10, %11, %cst_12 {dimension_numbers = #tpu.dot_dimension_numbers<[1], [0], [0], [1], [0, 0, 1, 1], [], []>} : vector<16x32xbf16>, vector<32x32xbf16>, vector<16x32xf32> -> vector<16x32xf32>
      %c0_13 = arith.constant 0 : index
      %c0_14 = arith.constant 0 : index
      %13 = vector.load %arg4[%c0_13, %c0_14] : memref<1x32xf32, #tpu.memory_space<vmem>>, vector<1x32xf32>
      %14 = vector.broadcast %13 : vector<1x32xf32> to vector<16x32xf32>
      %15 = arith.addf %12, %14 : vector<16x32xf32>
      %16 = math.tanh %15 : vector<16x32xf32>
      %17 = arith.truncf %16 : vector<16x32xf32> to vector<16x32xbf16>
      %c0_15 = arith.constant 0 : index
      %c0_16 = arith.constant 0 : index
      %18 = vector.load %arg8[%c0_15, %c0_16] : memref<16x32xbf16, #tpu.memory_space<vmem>>, vector<16x32xbf16>
      tpu.vector_store %arg8[%c0_15, %c0_16], %17 {strides = array<i32>} : memref<16x32xbf16, #tpu.memory_space<vmem>>, vector<16x32xbf16>,
    } else {
    }
    %c0 = arith.constant 0 : index
    %c0_1 = arith.constant 0 : index
    %3 = vector.load %arg8[%c0, %c0_1] : memref<16x32xbf16, #tpu.memory_space<vmem>>, vector<16x32xbf16>
    %c0_2 = arith.constant 0 : index
    %c0_3 = arith.constant 0 : index
    %4 = vector.load %arg5[%c0_2, %c0_3] : memref<32x128xbf16, #tpu.memory_space<vmem>>, vector<32x128xbf16>
    %cst = arith.constant dense<0.000000e+00> : vector<16x128xf32>
    %5 = tpu.matmul %3, %4, %cst {dimension_numbers = #tpu.dot_dimension_numbers<[1], [0], [0], [1], [0, 0, 1, 1], [], []>} : vector<16x32xbf16>, vector<32x128xbf16>, vector<16x128xf32> -> vector<16x128xf32>
    %c0_4 = arith.constant 0 : index
    %c0_5 = arith.constant 0 : index
    %6 = vector.load %arg6[%c0_4, %c0_5] : memref<1x128xf32, #tpu.memory_space<vmem>>, vector<1x128xf32>
    %7 = vector.broadcast %6 : vector<1x128xf32> to vector<16x128xf32>
    %8 = arith.addf %5, %7 : vector<16x128xf32>
    %c0_6 = arith.constant 0 : index
    %c0_7 = arith.constant 0 : index
    %9 = vector.load %arg7[%c0_6, %c0_7] : memref<16x128xf32, #tpu.memory_space<vmem>>, vector<16x128xf32>
    tpu.vector_store %arg7[%c0_6, %c0_7], %8 {strides = array<i32>} : memref<16x128xf32, #tpu.memory_space<vmem>>, vector<16x128xf32>,
    return
  }
  func.func @transform_0(%arg0: i32, %arg1: i32) -> (i32, i32) {
    %c0_i32 = arith.constant 0 : i32
    %c0_i32_0 = arith.constant 0 : i32
    return %arg0, %c0_i32 : i32, i32
  }
  func.func @transform_1(%arg0: i32, %arg1: i32) -> (i32, i32) {
    %c0_i32 = arith.constant 0 : i32
    %c0_i32_0 = arith.constant 0 : i32
    %c0_i32_1 = arith.constant 0 : i32
    return %c0_i32, %c0_i32_0 : i32, i32
  }
  func.func @transform_2(%arg0: i32, %arg1: i32) -> (i32, i32) {
    %c0_i32 = arith.constant 0 : i32
    %c0_i32_0 = arith.constant 0 : i32
    %c0_i32_1 = arith.constant 0 : i32
    return %c0_i32, %c0_i32_0 : i32, i32
  }
  func.func @transform_3(%arg0: i32, %arg1: i32) -> (i32, i32) {
    %c0_i32 = arith.constant 0 : i32
    %c0_i32_0 = arith.constant 0 : i32
    return %c0_i32, %arg1 : i32, i32
  }
  func.func @transform_4(%arg0: i32, %arg1: i32) -> (i32, i32) {
    %c0_i32 = arith.constant 0 : i32
    %c0_i32_0 = arith.constant 0 : i32
    return %c0_i32, %arg1 : i32, i32
  }
  func.func @transform_5(%arg0: i32, %arg1: i32) -> (i32, i32) {
    %c0_i32 = arith.constant 0 : i32
    return %arg0, %arg1 : i32, i32
  }
}

</mosaic_0001>

<bundles_post_ra>
// kernel: tpu_custom_call.1
= control target key start
LH: loop header
LB: loop body
LE: loop exit
PB: predicated region body
PF: predicated region fallthrough
CT: control target
= control target key end

     0   :  { %10 = vsyncpa [#allocation4], 0  ;;  %s492_s0 = inlined_call_operand.hbm [shape: bf16[16,32], index: 0, kind: input, shape index: {}]   ;;  %s493_s1 = inlined_call_operand.hbm [shape: bf16[32,32], index: 1, kind: input, shape index: {}]   ;;  %s494_s2 = inlined_call_operand.vmem [shape: f32[1,32], index: 2, kind: input, shape index: {}]   ;;  %s495_s3 = inlined_call_operand.hbm [shape: bf16[32,128], index: 3, kind: input, shape index: {}]   ;;  %s496_s4 = inlined_call_operand.vmem [shape: f32[1,128], index: 4, kind: input, shape index: {}]   ;;  %s497_s5 = inlined_call_operand.hbm [shape: f32[16,128], index: 5, kind: output, shape index: {}]  }
   0x1   :  { %11 = vsyncpa [#allocation7], 0 }
   0x2   :  { %12 = vsyncpa [#allocation5], 0  ;;  %s379_s18 = smov [#allocation6]   ;;  %s380_s20 = smov [#allocation3]  }
   0x3   :  { %s30_s19 = sshll.u32 %s379_s18, 4  ;;  %s18_s21 = sshll.u32 %s380_s20, 4  ;;  %s31_s19 = int_to_ptr.vmem [resolvable:$true] %s30_s19  ;;  %s419_s21 = int_to_ptr.vmem [resolvable:$true] %s18_s21 }
   0x4   :  { %s285_s24 = scalar_lea.hbm %s493_s1, 256 }
   0x5   :  { %p286_p0 = scmp.ne.s32.totalorder %s493_s1, %s285_s24  ;;  %p289_p1 = scmp.lt.u32.totalorder %s285_s24, %s493_s1 }
   0x7   :  { %p291_p2 = pnand %p289_p1, %p286_p0 }
   0x9   :  { %294 = shalt.err (!%p291_p2)
}
   0xa   :  { %s295_s29 = scalar_lea.vmem %s31_s19, 256  ;;  %p300_p4 = scmp.lt.s32.totalorder %s31_s19, %s31_s19 }
   0xb   :  { %p296_p3 = scmp.ne.s32.totalorder %s31_s19, %s295_s29  ;;  %p301_p5 = scmp.lt.s32.totalorder %s295_s29, %s295_s29 }
   0xd   :  { %p302_p6 = por %p301_p5, %p300_p4 }
   0xf   :  { %p303_p7 = pnand %p302_p6, %p296_p3 }
  0x11   :  { %306 = shalt.err (!%p303_p7)
}
  0x12   :  { %s381_s30 = smov 64   ;;  %s382_s6 = smov 4  }
  0x13   :  { %36 = dma.hbm_to_vmem [thread:$0]  %s493_s1, 256, %s31_s19, [#allocation7], %s381_s30, %s381_s30, %s382_s6  }
  0x14   :  { %s307_s11 = scalar_lea.hbm %s492_s0, 128 }
  0x15   :  { %p308_p8 = scmp.ne.s32.totalorder %s492_s0, %s307_s11  ;;  %p311_p9 = scmp.lt.u32.totalorder %s307_s11, %s492_s0 }
  0x17   :  { %p313_p10 = pnand %p311_p9, %p308_p8 }
  0x19   :  { %316 = shalt.err (!%p313_p10)
}
  0x1a   :  { %s317_s16 = scalar_lea.vmem %s419_s21, 128  ;;  %p322_p12 = scmp.lt.s32.totalorder %s419_s21, %s419_s21 }
  0x1b   :  { %p318_p11 = scmp.ne.s32.totalorder %s419_s21, %s317_s16  ;;  %p323_p13 = scmp.lt.s32.totalorder %s317_s16, %s317_s16 }
  0x1d   :  { %p324_p0 = por %p323_p13, %p322_p12 }
  0x1f   :  { %p325_p1 = pnand %p324_p0, %p318_p11 }
  0x21   :  { %328 = shalt.err (!%p325_p1)
}
  0x22   :  { %24 = dma.hbm_to_vmem [thread:$0]  %s492_s0, 128, %s419_s21, [#allocation4], %s381_s30, %s381_s30, %s382_s6  }
  0x23   :  { %s383_s18 = smov [#allocation8]   ;;  %s329_s23 = scalar_lea.hbm %s495_s3, 256 }
  0x24   :  { %s44_s19 = sshll.u32 %s383_s18, 4  ;;  %p330_p2 = scmp.ne.s32.totalorder %s495_s3, %s329_s23  ;;  %s45_s19 = int_to_ptr.vmem [resolvable:$true] %s44_s19 }
  0x25   :  { %p333_p3 = scmp.lt.u32.totalorder %s329_s23, %s495_s3 }
  0x27   :  { %p335_p4 = pnand %p333_p3, %p330_p2 }
  0x29   :  { %338 = shalt.err (!%p335_p4)
}
  0x2a   :  { %s339_s28 = scalar_lea.vmem %s45_s19, 256  ;;  %p344_p6 = scmp.lt.s32.totalorder %s45_s19, %s45_s19 }
  0x2b   :  { %p340_p5 = scmp.ne.s32.totalorder %s45_s19, %s339_s28  ;;  %p345_p7 = scmp.lt.s32.totalorder %s339_s28, %s339_s28 }
  0x2d   :  { %p346_p8 = por %p345_p7, %p344_p6 }
  0x2f   :  { %p347_p9 = pnand %p346_p8, %p340_p5 }
  0x31   :  { %350 = shalt.err (!%p347_p9)
}
  0x32   :  { %50 = dma.hbm_to_vmem [thread:$0]  %s495_s3, 256, %s45_s19, [#allocation7], %s381_s30, %s381_s30, %s382_s6  }
  0x33   :  { %373 = dma.done.wait [#allocation4], 128  }
  0x34   :  { %374 = vsyncadd [#allocation4], 4294967168 }
  0x35   :  { %375 = dma.done.wait [#allocation7], 512  }
  0x36   :  { %376 = vsyncadd [#allocation7], 4294966784  ;;  %v384_v0 = vmov 0.0   ;;  %vm385_vm0 = vmmov 0   ;;  %v276_v1 = vld [vmem:[#allocation6] sm:$0xff]   ;;  %v277_v2 = vld [vmem:[#allocation6 + $0x8] sm:$0xff]  }
  0x37   :  { %250 = vmatprep.subr.bf16.mxu0 %v384_v0  ;;  %254 = vmatprep.mubr.msk.bf16.mxu0 %vm385_vm0, %v384_v0  ;;  %v278_v3 = vld [vmem:[#allocation3] sm:$0xff]   ;;  %vm97_vm1 = vcmask 261120   ;;  %v279_v4 = vld [vmem:[#allocation8] sm:$0xff]  }
  0x38   :  { %258 = vmatprep.subr.bf16.mxu1 %v384_v0  ;;  %262 = vmatprep.mubr.msk.bf16.mxu1 %vm385_vm0, %v384_v0  ;;  %v280_v5 = vld [vmem:[#allocation8 + $0x8] sm:$0xff]   ;;  %v235_v6 = vld [vmem:[%s494_s2] ss:$0 sm:$0xff]  ;;  %s386_s2 = smov [#allocation9]  }
  0x39   :  { %251 = vmatpush3.bf16.msra.mxu0 %v276_v1  ;;  %259 = vmatpush3.bf16.msra.mxu1 %v279_v4  ;;  %v240_v17 = vld [vmem:[%s496_s4] ss:$0 sm:$0xff]  ;;  %s222_s7 = sshll.u32 %s386_s2, 4  ;;  %s223_s7 = int_to_ptr.vmem [resolvable:$true] %s222_s7 }
  0x3a   :  { %252 = vmatprep.subr.bf16.mxu0 %v384_v0  ;;  %260 = vmatprep.subr.bf16.mxu1 %v384_v0  ;;  %s351_s8 = scalar_lea.vmem %s223_s7, 256  ;;  %p356_p11 = scmp.lt.s32.totalorder %s223_s7, %s223_s7 }
  0x3b   :  { %p352_p10 = scmp.ne.s32.totalorder %s223_s7, %s351_s8  ;;  %p357_p12 = scmp.lt.s32.totalorder %s351_s8, %s351_s8 }
  0x3d   :  { %253 = vmatpush3.bf16.msra.mxu0 %v277_v2  ;;  %261 = vmatpush3.bf16.msra.mxu1 %v280_v5  ;;  %p358_p13 = por %p357_p12, %p356_p11 }
  0x3f   :  { %p359_p0 = pnand %p358_p13, %p352_p10 }
  0x40   :  { %255 = vmatmul.mubr.msk.bf16.vlgmr.msra.gmra.mrb[0].mxu0 %vm97_vm1, %v278_v3 }
 0x113   :  { %v135_v7 = vpop.f32.mrb[0].mxu0 }
 0x114   :  { %v136_v8 = vadd.f32 %v235_v6, %v135_v7  ;;  %v256_v9 = vpop.f32.mrb[1].mxu0 }
 0x115   :  { %v138_v10 = vpop.f32.mrb[2].mxu0 }
 0x116   :  { %v139_v11 = vadd.f32 %v235_v6, %v138_v10  ;;  %v257_v12 = vpop.f32.mrb[3].mxu0  ;;  %281 = vtanh.f32 %v136_v8 }
 0x118   :  { %283 = vtanh.f32 %v139_v11 }
 0x120   :  { %v282_v13 = vpop.eup %281 }
 0x122   :  { %v284_v14 = vpop.eup %283 }
 0x123   :  { %v144_v15 = vpack.c.bf16 %v284_v14, %v282_v13 }
 0x125   :  { %145 = vst.msk [vmem:[#allocation2] sm:$0xff] %vm97_vm1, %v144_v15 }
 0x12c   :  { %v146_v16 = vld [vmem:[#allocation2] sm:$0xff] }
 0x12d   :  { %263 = vmatmul.mubr.msk.bf16.vlgmr.msra.gmra.mrb[0].mxu1 %vm97_vm1, %v146_v16 }
 0x200   :  { %v208_v18 = vpop.f32.mrb[0].mxu1 }
 0x201   :  { %v209_v19 = vadd.f32 %v240_v17, %v208_v18  ;;  %v264_v20 = vpop.f32.mrb[1].mxu1 }
 0x202   :  { %v211_v21 = vpop.f32.mrb[2].mxu1 }
 0x203   :  { %215 = vst [vmem:[#allocation9] sm:$0xff] %v209_v19  ;;  %v212_v22 = vadd.f32 %v240_v17, %v211_v21  ;;  %v265_v23 = vpop.f32.mrb[3].mxu1 }
 0x205   :  { %216 = vst [vmem:[#allocation9 + $0x8] sm:$0xff] %v212_v22 }
 0x206   :  { %362 = shalt.err (!%p359_p0)
}
 0x207   :  { %s363_s10 = scalar_lea.hbm %s497_s5, 256 }
 0x208   :  { %p364_p1 = scmp.ne.s32.totalorder %s497_s5, %s363_s10  ;;  %p367_p2 = scmp.lt.u32.totalorder %s363_s10, %s497_s5 }
 0x20a   :  { %p369_p3 = pnand %p367_p2, %p364_p1 }
 0x20c   :  { %372 = shalt.err (!%p369_p3)
}
 0x20d   :  { %s387_s15 = smov 128   ;;  %s388_s16 = smov 8  }
 0x20e   :  { %228 = dma.vmem_to_hbm [thread:$0]  %s223_s7, 256, %s497_s5, [#allocation5], %s387_s15, %s387_s15, %s388_s16  }
 0x20f   :  { %377 = dma.done.wait [#allocation5], 256  }
 0x210   :  { %378 = vsyncadd [#allocation5], 4294967040 }
 0x211   :  { %232 = vsyncpa [#allocation4], 1 }
 0x212   :  { %233 = vsyncpa [#allocation7], 1 }
 0x213   :  { %234 = vsyncpa [#allocation5], 1 }

</bundles_post_ra>
